<compile_context>
chip_gen: v5e
topology: v5e:2x2
jax: 0.10.0
libtpu: 0.0.40
codegen_flags: <defaults>
</compile_context>

<pallas_src>
import jax
import jax.numpy as jnp
from jax import lax
from jax.experimental import pallas as pl
from jax.experimental.pallas import tpu as pltpu

LANES = 128
TM_MAX = 4096     # max rows per tile (multiple of 32): 4096*128*4B = 2 MiB (f32)
ILP_ROWS = 32     # accumulator rows per quantity (4 vregs of ILP) when tm allows


def _cdiv(a, b):
    return -(-a // b)


def _round_up(x, m):
    return _cdiv(x, m) * m


def _sublane_granule(*dtypes):
    """Minimum row granule so packed sub-32-bit dtypes keep dense tiles."""
    g = 8
    for dt in dtypes:
        g = max(g, {4: 8, 2: 16, 1: 32}.get(jnp.dtype(dt).itemsize, 32))
    return g


def _num_tensorcores():
    """Best-effort TensorCores-per-device (megacore v4/v5p and v7x -> 2)."""
    try:
        kind = jax.devices()[0].device_kind.lower()
    except Exception:
        return 1
    if "lite" in kind or "v5e" in kind or "v6e" in kind or "v6" in kind:
        return 1
    if "v4" in kind or "v5p" in kind or "v7" in kind or "7x" in kind:
        return 2
    return 1


def _make_ccc_partial_kernel(rows_valid, t_split):
    """Kernel factory: accumulate 5 moment partial-sum slabs per parallel slice.

    o_ref block (1, 5, acc_rows, 128) is resident across the reduction axis:
      [0] sum(p)  [1] sum(t)  [2] sum(p*p)  [3] sum(t*t)  [4] sum(p*t)
    """

    def kernel(p_ref, t_ref, o_ref):
        pi = pl.program_id(0)
        ti = pl.program_id(1)

        @pl.when(ti == 0)
        def _init():
            o_ref[...] = jnp.zeros_like(o_ref)

        tm = p_ref.shape[0]
        acc_rows = o_ref.shape[2]
        chunks = tm // acc_rows

        # Stream in the original dtype; cast on-chip.
        p = p_ref[...].astype(jnp.float32)
        t = t_ref[...].astype(jnp.float32)

        def accumulate(pv, tv):
            # (chunks, acc_rows, 128): acc_rows/8 independent vreg chains per
            # quantity instead of one long serial vadd chain.
            # TODO(synk): on v7x with bf16 inputs the VALU slot can become
            # binding; offload the plain row-sum folds to the idle MXU via a
            # hoisted ones((8, tm)) matmul if a bundle dump shows it.
            p3 = pv.reshape(chunks, acc_rows, LANES)
            t3 = tv.reshape(chunks, acc_rows, LANES)
            o_ref[0, 0] += jnp.sum(p3, axis=0)
            o_ref[0, 1] += jnp.sum(t3, axis=0)
            o_ref[0, 2] += jnp.sum(p3 * p3, axis=0)
            o_ref[0, 3] += jnp.sum(t3 * t3, axis=0)
            o_ref[0, 4] += jnp.sum(p3 * t3, axis=0)

        # Logical (unclamped) first row handled by this grid step.
        row_start = (pi * t_split + ti) * tm

        @pl.when(row_start + tm <= rows_valid)
        def _full_tile():
            accumulate(p, t)

        @pl.when(row_start + tm > rows_valid)
        def _ragged_tile():
            # Final (or clamped, fully out-of-range) block: zero rows past the
            # true row count so stale VMEM never contaminates the sums.
            ridx = lax.broadcasted_iota(jnp.int32, (tm, LANES), 0) + row_start
            valid = ridx < rows_valid
            accumulate(jnp.where(valid, p, 0.0), jnp.where(valid, t, 0.0))

    return kernel


def _moment_sums_pallas(p2d, t2d, rows, num_tc):
    """Five global moment sums over a (rows, 128) slab via a Pallas kernel."""
    granule = _sublane_granule(p2d.dtype, t2d.dtype)

    # Megacore / v7x split only when the chip has >1 TC and there is enough work.
    p_split = num_tc if (num_tc > 1 and rows >= 2 * granule) else 1

    rows_per_slice = _cdiv(rows, p_split)
    t_split = _cdiv(rows_per_slice, TM_MAX)
    tm = _round_up(_cdiv(rows_per_slice, t_split), granule)
    if tm >= ILP_ROWS:
        tm = _round_up(tm, ILP_ROWS)
    # Never let a block exceed the array's row extent; only the final block
    # overhangs and the kernel masks it.
    tm = min(tm, TM_MAX, (rows // granule) * granule)
    acc_rows = ILP_ROWS if tm % ILP_ROWS == 0 else granule

    nblocks = _cdiv(rows, tm)
    t_split = _cdiv(nblocks, p_split)

    def in_index_map(pi, ti):
        # Grid steps past the last block re-read it (clamped); the kernel masks
        # their contribution to exactly zero.
        return (jnp.minimum(pi * t_split + ti, nblocks - 1), 0)

    bytes_in = rows * LANES * (
        jnp.dtype(p2d.dtype).itemsize + jnp.dtype(t2d.dtype).itemsize
    )
    cost = pl.CostEstimate(
        flops=8 * rows * LANES,
        transcendentals=0,
        bytes_accessed=bytes_in + p_split * 5 * acc_rows * LANES * 4,
    )

    partials = pl.pallas_call(
        _make_ccc_partial_kernel(rows, t_split),
        out_shape=jax.ShapeDtypeStruct((p_split, 5, acc_rows, LANES), jnp.float32),
        grid_spec=pltpu.PrefetchScalarGridSpec(
            num_scalar_prefetch=0,
            grid=(p_split, t_split),
            in_specs=[
                pl.BlockSpec((tm, LANES), in_index_map),
                pl.BlockSpec((tm, LANES), in_index_map),
            ],
            out_specs=pl.BlockSpec(
                (1, 5, acc_rows, LANES), lambda pi, ti: (pi, 0, 0, 0)
            ),
        ),
        compiler_params=pltpu.CompilerParams(
            dimension_semantics=("parallel", "arbitrary"),
        ),
        cost_estimate=cost,
    )(p2d, t2d)

    return jnp.sum(partials, axis=(0, 2, 3))  # (5,) f32


def ccc_loss(predictions, targets):
    """Pallas-backed CCC loss (1 - CCC). Returns a scalar float32."""
    assert predictions.shape == targets.shape
    n_elems = predictions.size
    assert n_elems >= 2, "CCC needs at least 2 elements (unbiased variance)"

    flat_p = predictions.reshape(-1)
    flat_t = targets.reshape(-1)

    granule = _sublane_granule(predictions.dtype, targets.dtype)
    rows = n_elems // LANES
    bulk = rows * LANES
    rem = n_elems - bulk

    sums = jnp.zeros((5,), jnp.float32)

    if rows >= granule:
        # Lane-dense (rows, 128) view of the 128-aligned bulk -- no zero padding
        # is streamed; the ragged final row block is masked inside the kernel.
        p2d = (flat_p if rem == 0 else flat_p[:bulk]).reshape(rows, LANES)
        t2d = (flat_t if rem == 0 else flat_t[:bulk]).reshape(rows, LANES)
        sums = sums + _moment_sums_pallas(p2d, t2d, rows, _num_tensorcores())
        tail_p = flat_p[bulk:]
        tail_t = flat_t[bulk:]
    else:
        # Tiny input (< granule*128 elements): kernel launch overhead would
        # dominate; the whole reduction is the "tail".
        tail_p = flat_p
        tail_t = flat_t

    if tail_p.size:
        tp = tail_p.astype(jnp.float32)
        tt = tail_t.astype(jnp.float32)
        sums = sums + jnp.stack(
            [jnp.sum(tp), jnp.sum(tt), jnp.sum(tp * tp), jnp.sum(tt * tt),
             jnp.sum(tp * tt)]
        )

    sum_p, sum_t, sum_pp, sum_tt, sum_pt = (
        sums[0], sums[1], sums[2], sums[3], sums[4]
    )

    # Finalize: n is an exact python int folded in at trace time; n*mean^2 is
    # formed as sum*mean to avoid a large-n f32 multiply.
    # torch.var default is unbiased (correction=1); covariance uses torch.mean.
    # TODO(synk): for very large N or |mean| >> std, the single-pass
    # (sum_sq - sum*mean) form cancels catastrophically; switch to per-tile
    # centered (Chan-merge) or Kahan-compensated accumulation if exact parity
    # with torch at scale is required.
    n = float(n_elems)
    pred_mean = sum_p / n
    target_mean = sum_t / n
    pred_var = (sum_pp - sum_p * pred_mean) / (n - 1.0)
    target_var = (sum_tt - sum_t * target_mean) / (n - 1.0)
    covariance = (sum_pt - sum_p * target_mean) / n
    numerator = 2.0 * covariance
    denominator = pred_var + target_var + (pred_mean - target_mean) ** 2
    ccc = numerator / (denominator + 1e-8)
    return (1.0 - ccc).astype(jnp.float32)


def ccc_loss_ref(predictions, targets):
    """Pure-JAX reference mirroring the PyTorch module exactly."""
    p = predictions.astype(jnp.float32).ravel()
    t = targets.astype(jnp.float32).ravel()
    pm = jnp.mean(p)
    tm = jnp.mean(t)
    pv = jnp.var(p, ddof=1)
    tv = jnp.var(t, ddof=1)
    cov = jnp.mean((p - pm) * (t - tm))
    ccc = 2.0 * cov / (pv + tv + (pm - tm) ** 2 + 1e-8)
    return 1.0 - ccc


if __name__ == "__main__":
    key = jax.random.PRNGKey(0)
    k1, k2, k3, k4 = jax.random.split(key, 4)

    # Small NCHW-like inputs: predictions / targets of shape [2, 4, 16, 16].
    shape = (2, 4, 16, 16)
    predictions = jax.random.normal(k1, shape, dtype=jnp.float32)
    targets = 0.7 * predictions + 0.3 * jax.random.normal(k2, shape, dtype=jnp.float32)

    loss = ccc_loss(predictions, targets)
    jax.block_until_ready(loss)
    ref = ccc_loss_ref(predictions, targets)
    assert jnp.allclose(loss, ref, atol=1e-5, rtol=1e-5), (loss, ref)

    # Ragged shape (rows not a multiple of 8 plus a sub-128 tail) exercises the
    # in-kernel mask and the wrapper-side tail fold.
    shape2 = (5, 333)
    p2 = jax.random.normal(k3, shape2, dtype=jnp.float32)
    t2 = 0.5 * p2 + 0.5 * jax.random.normal(k4, shape2, dtype=jnp.float32)
    loss2 = ccc_loss(p2, t2)
    jax.block_until_ready(loss2)
    ref2 = ccc_loss_ref(p2, t2)
    assert jnp.allclose(loss2, ref2, atol=1e-5, rtol=1e-5), (loss2, ref2)

    print("KERNEL_OK")
</pallas_src>

<mosaic_0001>
module attributes {stable_mosaic.version = 11 : i64} {
  func.func @kernel(%arg0: i32, %arg1: i32, %arg2: memref<16x128xf32, #tpu.memory_space<vmem>>, %arg3: memref<16x128xf32, #tpu.memory_space<vmem>>, %arg4: memref<1x5x8x128xf32, #tpu.memory_space<vmem>>) attributes {dimension_semantics = [#tpu.dimension_semantics<parallel>, #tpu.dimension_semantics<arbitrary>], iteration_bounds = array<i64: 1, 1>, scalar_prefetch = 0 : i64, scratch_operands = 0 : i64, tpu.core_type = #tpu.core_type<tc>, window_params = [{transform_indices = @transform_0, window_bounds = array<i64: 16, 128>}, {transform_indices = @transform_1, window_bounds = array<i64: 16, 128>}, {transform_indices = @transform_2, window_bounds = array<i64: 1, 5, 8, 128>}]} {
    %c0_i32 = arith.constant 0 : i32
    %0 = arith.cmpi eq, %arg1, %c0_i32 : i32
    %1 = arith.extui %0 : i1 to i32
    %c0_i32_0 = arith.constant 0 : i32
    %2 = arith.cmpi ne, %1, %c0_i32_0 : i32
    scf.if %2 {
      %cst = arith.constant 0.000000e+00 : f32
      %16 = vector.broadcast %cst : f32 to vector<1x5x8x128xf32>
      %c0_10 = arith.constant 0 : index
      %c0_11 = arith.constant 0 : index
      %c0_12 = arith.constant 0 : index
      %c0_13 = arith.constant 0 : index
      %17 = vector.load %arg4[%c0_10, %c0_11, %c0_12, %c0_13] : memref<1x5x8x128xf32, #tpu.memory_space<vmem>>, vector<1x5x8x128xf32>
      tpu.vector_store %arg4[%c0_10, %c0_11, %c0_12, %c0_13], %16 {strides = array<i32>} : memref<1x5x8x128xf32, #tpu.memory_space<vmem>>, vector<1x5x8x128xf32>,
    } else {
    }
    %c0 = arith.constant 0 : index
    %c0_1 = arith.constant 0 : index
    %3 = vector.load %arg2[%c0, %c0_1] : memref<16x128xf32, #tpu.memory_space<vmem>>, vector<16x128xf32>
    %c0_2 = arith.constant 0 : index
    %c0_3 = arith.constant 0 : index
    %4 = vector.load %arg3[%c0_2, %c0_3] : memref<16x128xf32, #tpu.memory_space<vmem>>, vector<16x128xf32>
    %c1_i32 = arith.constant 1 : i32
    %5 = arith.muli %arg0, %c1_i32 : i32
    %6 = arith.addi %5, %arg1 : i32
    %c16_i32 = arith.constant 16 : i32
    %7 = arith.muli %6, %c16_i32 : i32
    %c16_i32_4 = arith.constant 16 : i32
    %8 = arith.addi %7, %c16_i32_4 : i32
    %c16_i32_5 = arith.constant 16 : i32
    %9 = arith.cmpi sle, %8, %c16_i32_5 : i32
    %10 = arith.extui %9 : i1 to i32
    %c0_i32_6 = arith.constant 0 : i32
    %11 = arith.cmpi ne, %10, %c0_i32_6 : i32
    scf.if %11 {
      %16 = vector.shape_cast %3 : vector<16x128xf32> to vector<2x8x128xf32>
      %17 = vector.shape_cast %4 : vector<16x128xf32> to vector<2x8x128xf32>
      %c0_10 = arith.constant 0 : index
      %c0_11 = arith.constant 0 : index
      %c0_12 = arith.constant 0 : index
      %c0_13 = arith.constant 0 : index
      %18 = vector.load %arg4[%c0_10, %c0_11, %c0_12, %c0_13] : memref<1x5x8x128xf32, #tpu.memory_space<vmem>>, vector<1x1x8x128xf32>
      %19 = vector.shape_cast %18 : vector<1x1x8x128xf32> to vector<8x128xf32>
      %cst = arith.constant dense<0.000000e+00> : vector<8x128xf32>
      %20 = vector.multi_reduction <add>, %16, %cst [0] : vector<2x8x128xf32> to vector<8x128xf32>
      %21 = arith.addf %19, %20 : vector<8x128xf32>
      %c0_14 = arith.constant 0 : index
      %c0_15 = arith.constant 0 : index
      %c0_16 = arith.constant 0 : index
      %c0_17 = arith.constant 0 : index
      %22 = vector.load %arg4[%c0_14, %c0_15, %c0_16, %c0_17] : memref<1x5x8x128xf32, #tpu.memory_space<vmem>>, vector<1x1x8x128xf32>
      %23 = vector.shape_cast %22 : vector<1x1x8x128xf32> to vector<8x128xf32>
      %24 = vector.shape_cast %21 : vector<8x128xf32> to vector<1x1x8x128xf32>
      tpu.vector_store %arg4[%c0_14, %c0_15, %c0_16, %c0_17], %24 {strides = array<i32>} : memref<1x5x8x128xf32, #tpu.memory_space<vmem>>, vector<1x1x8x128xf32>,
      %c0_18 = arith.constant 0 : index
      %c1 = arith.constant 1 : index
      %c0_19 = arith.constant 0 : index
      %c0_20 = arith.constant 0 : index
      %25 = vector.load %arg4[%c0_18, %c1, %c0_19, %c0_20] : memref<1x5x8x128xf32, #tpu.memory_space<vmem>>, vector<1x1x8x128xf32>
      %26 = vector.shape_cast %25 : vector<1x1x8x128xf32> to vector<8x128xf32>
      %cst_21 = arith.constant dense<0.000000e+00> : vector<8x128xf32>
      %27 = vector.multi_reduction <add>, %17, %cst_21 [0] : vector<2x8x128xf32> to vector<8x128xf32>
      %28 = arith.addf %26, %27 : vector<8x128xf32>
      %c0_22 = arith.constant 0 : index
      %c1_23 = arith.constant 1 : index
      %c0_24 = arith.constant 0 : index
      %c0_25 = arith.constant 0 : index
      %29 = vector.load %arg4[%c0_22, %c1_23, %c0_24, %c0_25] : memref<1x5x8x128xf32, #tpu.memory_space<vmem>>, vector<1x1x8x128xf32>
      %30 = vector.shape_cast %29 : vector<1x1x8x128xf32> to vector<8x128xf32>
      %31 = vector.shape_cast %28 : vector<8x128xf32> to vector<1x1x8x128xf32>
      tpu.vector_store %arg4[%c0_22, %c1_23, %c0_24, %c0_25], %31 {strides = array<i32>} : memref<1x5x8x128xf32, #tpu.memory_space<vmem>>, vector<1x1x8x128xf32>,
      %c0_26 = arith.constant 0 : index
      %c2 = arith.constant 2 : index
      %c0_27 = arith.constant 0 : index
      %c0_28 = arith.constant 0 : index
      %32 = vector.load %arg4[%c0_26, %c2, %c0_27, %c0_28] : memref<1x5x8x128xf32, #tpu.memory_space<vmem>>, vector<1x1x8x128xf32>
      %33 = vector.shape_cast %32 : vector<1x1x8x128xf32> to vector<8x128xf32>
      %34 = arith.mulf %16, %16 : vector<2x8x128xf32>
      %cst_29 = arith.constant dense<0.000000e+00> : vector<8x128xf32>
      %35 = vector.multi_reduction <add>, %34, %cst_29 [0] : vector<2x8x128xf32> to vector<8x128xf32>
      %36 = arith.addf %33, %35 : vector<8x128xf32>
      %c0_30 = arith.constant 0 : index
      %c2_31 = arith.constant 2 : index
      %c0_32 = arith.constant 0 : index
      %c0_33 = arith.constant 0 : index
      %37 = vector.load %arg4[%c0_30, %c2_31, %c0_32, %c0_33] : memref<1x5x8x128xf32, #tpu.memory_space<vmem>>, vector<1x1x8x128xf32>
      %38 = vector.shape_cast %37 : vector<1x1x8x128xf32> to vector<8x128xf32>
      %39 = vector.shape_cast %36 : vector<8x128xf32> to vector<1x1x8x128xf32>
      tpu.vector_store %arg4[%c0_30, %c2_31, %c0_32, %c0_33], %39 {strides = array<i32>} : memref<1x5x8x128xf32, #tpu.memory_space<vmem>>, vector<1x1x8x128xf32>,
      %c0_34 = arith.constant 0 : index
      %c3 = arith.constant 3 : index
      %c0_35 = arith.constant 0 : index
      %c0_36 = arith.constant 0 : index
      %40 = vector.load %arg4[%c0_34, %c3, %c0_35, %c0_36] : memref<1x5x8x128xf32, #tpu.memory_space<vmem>>, vector<1x1x8x128xf32>
      %41 = vector.shape_cast %40 : vector<1x1x8x128xf32> to vector<8x128xf32>
      %42 = arith.mulf %17, %17 : vector<2x8x128xf32>
      %cst_37 = arith.constant dense<0.000000e+00> : vector<8x128xf32>
      %43 = vector.multi_reduction <add>, %42, %cst_37 [0] : vector<2x8x128xf32> to vector<8x128xf32>
      %44 = arith.addf %41, %43 : vector<8x128xf32>
      %c0_38 = arith.constant 0 : index
      %c3_39 = arith.constant 3 : index
      %c0_40 = arith.constant 0 : index
      %c0_41 = arith.constant 0 : index
      %45 = vector.load %arg4[%c0_38, %c3_39, %c0_40, %c0_41] : memref<1x5x8x128xf32, #tpu.memory_space<vmem>>, vector<1x1x8x128xf32>
      %46 = vector.shape_cast %45 : vector<1x1x8x128xf32> to vector<8x128xf32>
      %47 = vector.shape_cast %44 : vector<8x128xf32> to vector<1x1x8x128xf32>
      tpu.vector_store %arg4[%c0_38, %c3_39, %c0_40, %c0_41], %47 {strides = array<i32>} : memref<1x5x8x128xf32, #tpu.memory_space<vmem>>, vector<1x1x8x128xf32>,
      %c0_42 = arith.constant 0 : index
      %c4 = arith.constant 4 : index
      %c0_43 = arith.constant 0 : index
      %c0_44 = arith.constant 0 : index
      %48 = vector.load %arg4[%c0_42, %c4, %c0_43, %c0_44] : memref<1x5x8x128xf32, #tpu.memory_space<vmem>>, vector<1x1x8x128xf32>
      %49 = vector.shape_cast %48 : vector<1x1x8x128xf32> to vector<8x128xf32>
      %50 = arith.mulf %16, %17 : vector<2x8x128xf32>
      %cst_45 = arith.constant dense<0.000000e+00> : vector<8x128xf32>
      %51 = vector.multi_reduction <add>, %50, %cst_45 [0] : vector<2x8x128xf32> to vector<8x128xf32>
      %52 = arith.addf %49, %51 : vector<8x128xf32>
      %c0_46 = arith.constant 0 : index
      %c4_47 = arith.constant 4 : index
      %c0_48 = arith.constant 0 : index
      %c0_49 = arith.constant 0 : index
      %53 = vector.load %arg4[%c0_46, %c4_47, %c0_48, %c0_49] : memref<1x5x8x128xf32, #tpu.memory_space<vmem>>, vector<1x1x8x128xf32>
      %54 = vector.shape_cast %53 : vector<1x1x8x128xf32> to vector<8x128xf32>
      %55 = vector.shape_cast %52 : vector<8x128xf32> to vector<1x1x8x128xf32>
      tpu.vector_store %arg4[%c0_46, %c4_47, %c0_48, %c0_49], %55 {strides = array<i32>} : memref<1x5x8x128xf32, #tpu.memory_space<vmem>>, vector<1x1x8x128xf32>,
    } else {
    }
    %c16_i32_7 = arith.constant 16 : i32
    %12 = arith.addi %7, %c16_i32_7 : i32
    %c16_i32_8 = arith.constant 16 : i32
    %13 = arith.cmpi sgt, %12, %c16_i32_8 : i32
    %14 = arith.extui %13 : i1 to i32
    %c0_i32_9 = arith.constant 0 : i32
    %15 = arith.cmpi ne, %14, %c0_i32_9 : i32
    scf.if %15 {
      %16 = tpu.iota {dimensions = array<i32: 0>} : vector<16x128xi32>
      %17 = vector.broadcast %7 : i32 to vector<16x128xi32>
      %18 = arith.addi %16, %17 : vector<16x128xi32>
      %c16_i32_10 = arith.constant 16 : i32
      %19 = vector.broadcast %c16_i32_10 : i32 to vector<16x128xi32>
      %20 = arith.cmpi slt, %18, %19 : vector<16x128xi32>
      %cst = arith.constant 0.000000e+00 : f32
      %21 = vector.broadcast %cst : f32 to vector<16x128xf32>
      %22 = arith.select %20, %3, %21 : vector<16x128xi1>, vector<16x128xf32>
      %cst_11 = arith.constant 0.000000e+00 : f32
      %23 = vector.broadcast %cst_11 : f32 to vector<16x128xf32>
      %24 = arith.select %20, %4, %23 : vector<16x128xi1>, vector<16x128xf32>
      %25 = vector.shape_cast %22 : vector<16x128xf32> to vector<2x8x128xf32>
      %26 = vector.shape_cast %24 : vector<16x128xf32> to vector<2x8x128xf32>
      %c0_12 = arith.constant 0 : index
      %c0_13 = arith.constant 0 : index
      %c0_14 = arith.constant 0 : index
      %c0_15 = arith.constant 0 : index
      %27 = vector.load %arg4[%c0_12, %c0_13, %c0_14, %c0_15] : memref<1x5x8x128xf32, #tpu.memory_space<vmem>>, vector<1x1x8x128xf32>
      %28 = vector.shape_cast %27 : vector<1x1x8x128xf32> to vector<8x128xf32>
      %cst_16 = arith.constant dense<0.000000e+00> : vector<8x128xf32>
      %29 = vector.multi_reduction <add>, %25, %cst_16 [0] : vector<2x8x128xf32> to vector<8x128xf32>
      %30 = arith.addf %28, %29 : vector<8x128xf32>
      %c0_17 = arith.constant 0 : index
      %c0_18 = arith.constant 0 : index
      %c0_19 = arith.constant 0 : index
      %c0_20 = arith.constant 0 : index
      %31 = vector.load %arg4[%c0_17, %c0_18, %c0_19, %c0_20] : memref<1x5x8x128xf32, #tpu.memory_space<vmem>>, vector<1x1x8x128xf32>
      %32 = vector.shape_cast %31 : vector<1x1x8x128xf32> to vector<8x128xf32>
      %33 = vector.shape_cast %30 : vector<8x128xf32> to vector<1x1x8x128xf32>
      tpu.vector_store %arg4[%c0_17, %c0_18, %c0_19, %c0_20], %33 {strides = array<i32>} : memref<1x5x8x128xf32, #tpu.memory_space<vmem>>, vector<1x1x8x128xf32>,
      %c0_21 = arith.constant 0 : index
      %c1 = arith.constant 1 : index
      %c0_22 = arith.constant 0 : index
      %c0_23 = arith.constant 0 : index
      %34 = vector.load %arg4[%c0_21, %c1, %c0_22, %c0_23] : memref<1x5x8x128xf32, #tpu.memory_space<vmem>>, vector<1x1x8x128xf32>
      %35 = vector.shape_cast %34 : vector<1x1x8x128xf32> to vector<8x128xf32>
      %cst_24 = arith.constant dense<0.000000e+00> : vector<8x128xf32>
      %36 = vector.multi_reduction <add>, %26, %cst_24 [0] : vector<2x8x128xf32> to vector<8x128xf32>
      %37 = arith.addf %35, %36 : vector<8x128xf32>
      %c0_25 = arith.constant 0 : index
      %c1_26 = arith.constant 1 : index
      %c0_27 = arith.constant 0 : index
      %c0_28 = arith.constant 0 : index
      %38 = vector.load %arg4[%c0_25, %c1_26, %c0_27, %c0_28] : memref<1x5x8x128xf32, #tpu.memory_space<vmem>>, vector<1x1x8x128xf32>
      %39 = vector.shape_cast %38 : vector<1x1x8x128xf32> to vector<8x128xf32>
      %40 = vector.shape_cast %37 : vector<8x128xf32> to vector<1x1x8x128xf32>
      tpu.vector_store %arg4[%c0_25, %c1_26, %c0_27, %c0_28], %40 {strides = array<i32>} : memref<1x5x8x128xf32, #tpu.memory_space<vmem>>, vector<1x1x8x128xf32>,
      %c0_29 = arith.constant 0 : index
      %c2 = arith.constant 2 : index
      %c0_30 = arith.constant 0 : index
      %c0_31 = arith.constant 0 : index
      %41 = vector.load %arg4[%c0_29, %c2, %c0_30, %c0_31] : memref<1x5x8x128xf32, #tpu.memory_space<vmem>>, vector<1x1x8x128xf32>
      %42 = vector.shape_cast %41 : vector<1x1x8x128xf32> to vector<8x128xf32>
      %43 = arith.mulf %25, %25 : vector<2x8x128xf32>
      %cst_32 = arith.constant dense<0.000000e+00> : vector<8x128xf32>
      %44 = vector.multi_reduction <add>, %43, %cst_32 [0] : vector<2x8x128xf32> to vector<8x128xf32>
      %45 = arith.addf %42, %44 : vector<8x128xf32>
      %c0_33 = arith.constant 0 : index
      %c2_34 = arith.constant 2 : index
      %c0_35 = arith.constant 0 : index
      %c0_36 = arith.constant 0 : index
      %46 = vector.load %arg4[%c0_33, %c2_34, %c0_35, %c0_36] : memref<1x5x8x128xf32, #tpu.memory_space<vmem>>, vector<1x1x8x128xf32>
      %47 = vector.shape_cast %46 : vector<1x1x8x128xf32> to vector<8x128xf32>
      %48 = vector.shape_cast %45 : vector<8x128xf32> to vector<1x1x8x128xf32>
      tpu.vector_store %arg4[%c0_33, %c2_34, %c0_35, %c0_36], %48 {strides = array<i32>} : memref<1x5x8x128xf32, #tpu.memory_space<vmem>>, vector<1x1x8x128xf32>,
      %c0_37 = arith.constant 0 : index
      %c3 = arith.constant 3 : index
      %c0_38 = arith.constant 0 : index
      %c0_39 = arith.constant 0 : index
      %49 = vector.load %arg4[%c0_37, %c3, %c0_38, %c0_39] : memref<1x5x8x128xf32, #tpu.memory_space<vmem>>, vector<1x1x8x128xf32>
      %50 = vector.shape_cast %49 : vector<1x1x8x128xf32> to vector<8x128xf32>
      %51 = arith.mulf %26, %26 : vector<2x8x128xf32>
      %cst_40 = arith.constant dense<0.000000e+00> : vector<8x128xf32>
      %52 = vector.multi_reduction <add>, %51, %cst_40 [0] : vector<2x8x128xf32> to vector<8x128xf32>
      %53 = arith.addf %50, %52 : vector<8x128xf32>
      %c0_41 = arith.constant 0 : index
      %c3_42 = arith.constant 3 : index
      %c0_43 = arith.constant 0 : index
      %c0_44 = arith.constant 0 : index
      %54 = vector.load %arg4[%c0_41, %c3_42, %c0_43, %c0_44] : memref<1x5x8x128xf32, #tpu.memory_space<vmem>>, vector<1x1x8x128xf32>
      %55 = vector.shape_cast %54 : vector<1x1x8x128xf32> to vector<8x128xf32>
      %56 = vector.shape_cast %53 : vector<8x128xf32> to vector<1x1x8x128xf32>
      tpu.vector_store %arg4[%c0_41, %c3_42, %c0_43, %c0_44], %56 {strides = array<i32>} : memref<1x5x8x128xf32, #tpu.memory_space<vmem>>, vector<1x1x8x128xf32>,
      %c0_45 = arith.constant 0 : index
      %c4 = arith.constant 4 : index
      %c0_46 = arith.constant 0 : index
      %c0_47 = arith.constant 0 : index
      %57 = vector.load %arg4[%c0_45, %c4, %c0_46, %c0_47] : memref<1x5x8x128xf32, #tpu.memory_space<vmem>>, vector<1x1x8x128xf32>
      %58 = vector.shape_cast %57 : vector<1x1x8x128xf32> to vector<8x128xf32>
      %59 = arith.mulf %25, %26 : vector<2x8x128xf32>
      %cst_48 = arith.constant dense<0.000000e+00> : vector<8x128xf32>
      %60 = vector.multi_reduction <add>, %59, %cst_48 [0] : vector<2x8x128xf32> to vector<8x128xf32>
      %61 = arith.addf %58, %60 : vector<8x128xf32>
      %c0_49 = arith.constant 0 : index
      %c4_50 = arith.constant 4 : index
      %c0_51 = arith.constant 0 : index
      %c0_52 = arith.constant 0 : index
      %62 = vector.load %arg4[%c0_49, %c4_50, %c0_51, %c0_52] : memref<1x5x8x128xf32, #tpu.memory_space<vmem>>, vector<1x1x8x128xf32>
      %63 = vector.shape_cast %62 : vector<1x1x8x128xf32> to vector<8x128xf32>
      %64 = vector.shape_cast %61 : vector<8x128xf32> to vector<1x1x8x128xf32>
      tpu.vector_store %arg4[%c0_49, %c4_50, %c0_51, %c0_52], %64 {strides = array<i32>} : memref<1x5x8x128xf32, #tpu.memory_space<vmem>>, vector<1x1x8x128xf32>,
    } else {
    }
    return
  }
  func.func @transform_0(%arg0: i32, %arg1: i32) -> (i32, i32) {
    %c1_i32 = arith.constant 1 : i32
    %0 = arith.muli %arg0, %c1_i32 : i32
    %1 = arith.addi %0, %arg1 : i32
    %c0_i32 = arith.constant 0 : i32
    %2 = arith.minsi %1, %c0_i32 : i32
    %c0_i32_0 = arith.constant 0 : i32
    %c0_i32_1 = arith.constant 0 : i32
    return %2, %c0_i32_0 : i32, i32
  }
  func.func @transform_1(%arg0: i32, %arg1: i32) -> (i32, i32) {
    %c1_i32 = arith.constant 1 : i32
    %0 = arith.muli %arg0, %c1_i32 : i32
    %1 = arith.addi %0, %arg1 : i32
    %c0_i32 = arith.constant 0 : i32
    %2 = arith.minsi %1, %c0_i32 : i32
    %c0_i32_0 = arith.constant 0 : i32
    %c0_i32_1 = arith.constant 0 : i32
    return %2, %c0_i32_0 : i32, i32
  }
  func.func @transform_2(%arg0: i32, %arg1: i32) -> (i32, i32, i32, i32) {
    %c0_i32 = arith.constant 0 : i32
    %c0_i32_0 = arith.constant 0 : i32
    %c0_i32_1 = arith.constant 0 : i32
    %c0_i32_2 = arith.constant 0 : i32
    return %arg0, %c0_i32, %c0_i32_0, %c0_i32_1 : i32, i32, i32, i32
  }
}

</mosaic_0001>

<bundles_post_ra>
// kernel: tpu_custom_call.1
= control target key start
LH: loop header
LB: loop body
LE: loop exit
PB: predicated region body
PF: predicated region fallthrough
CT: control target
= control target key end

     0   :  { %7 = vsyncpa [#allocation3], 0  ;;  %s306_s0 = inlined_call_operand.hbm [shape: f32[16,128], index: 0, kind: input, shape index: {}]   ;;  %s307_s1 = inlined_call_operand.hbm [shape: f32[16,128], index: 1, kind: input, shape index: {}]   ;;  %s308_s2 = inlined_call_operand.hbm [shape: f32[1,5,8,128], index: 2, kind: output, shape index: {}]  }
   0x1   :  { %8 = vsyncpa [#allocation6], 0 }
   0x2   :  { %9 = vsyncpa [#allocation4], 0  ;;  %s20_s11 = sshll.u32 %s306_s0, 4  ;;  %s268_s12 = smov [#allocation2]   ;;  %s21_s11 = int_to_ptr.hbm [resolvable:$true] %s20_s11 }
   0x3   :  { %s22_s13 = sshll.u32 %s268_s12, 4  ;;  %s39_s16 = sshll.u32 %s307_s1, 4  ;;  %s23_s13 = int_to_ptr.vmem [resolvable:$true] %s22_s13  ;;  %s40_s16 = int_to_ptr.hbm [resolvable:$true] %s39_s16 }
   0x4   :  { %s269_s17 = smov 128   ;;  %s270_s18 = smov 8  }
   0x5   :  { %28 = dma.hbm_to_vmem [thread:$0]  %s21_s11, 256, %s23_s13, [#allocation3], %s269_s17, %s269_s17, %s270_s18  }
   0x6   :  { %s271_s19 = smov [#allocation5]  }
   0x7   :  { %s41_s20 = sshll.u32 %s271_s19, 4  ;;  %s42_s20 = int_to_ptr.vmem [resolvable:$true] %s41_s20 }
   0x8   :  { %47 = dma.hbm_to_vmem [thread:$0]  %s40_s16, 256, %s42_s20, [#allocation6], %s269_s17, %s269_s17, %s270_s18  }
   0x9   :  { %262 = dma.done.wait [#allocation3], 256  }
   0xa   :  { %263 = vsyncadd [#allocation3], 4294967040 }
   0xb   :  { %264 = dma.done.wait [#allocation6], 256  }
   0xc   :  { %265 = vsyncadd [#allocation6], 4294967040  ;;  %v73_v0 = vld [vmem:[#allocation2] sm:$0xff]  ;;  %v74_v1 = vld [vmem:[#allocation2 + $0x8] sm:$0xff]  ;;  %s272_s0 = smov [#allocation7]   ;;  %s166_s23 = sshll.u32 %s308_s2, 4  ;;  %s167_s23 = int_to_ptr.hbm [resolvable:$true] %s166_s23 }
   0xd   :  { %v75_v2 = vld [vmem:[#allocation5] sm:$0xff]  ;;  %v85_v3 = vadd.f32 %v74_v1, %v73_v0  ;;  %v76_v4 = vld [vmem:[#allocation5 + $0x8] sm:$0xff]  ;;  %v95_v5 = vmul.f32 %v73_v0, %v73_v0  ;;  %v96_v6 = vmul.f32 %v74_v1, %v74_v1  ;;  %s164_s1 = sshll.u32 %s272_s0, 4  ;;  %s165_s1 = int_to_ptr.vmem [resolvable:$true] %s164_s1 }
   0xe   :  { %v102_v7 = vmul.f32 %v75_v2, %v75_v2  ;;  %v90_v8 = vadd.f32 %v76_v4, %v75_v2  ;;  %v103_v9 = vmul.f32 %v76_v4, %v76_v4  ;;  %v109_v10 = vmul.f32 %v75_v2, %v73_v0 }
   0xf   :  { %v110_v11 = vmul.f32 %v76_v4, %v74_v1  ;;  %v97_v12 = vadd.f32 %v96_v6, %v95_v5  ;;  %87 = vst [vmem:[#allocation7] sm:$0xff] %v85_v3 }
  0x10   :  { %v104_v13 = vadd.f32 %v103_v9, %v102_v7  ;;  %92 = vst [vmem:[#allocation7 + $0x8] sm:$0xff] %v90_v8 }
  0x11   :  { %v111_v14 = vadd.f32 %v110_v11, %v109_v10  ;;  %99 = vst [vmem:[#allocation7 + $0x10] sm:$0xff] %v97_v12 }
  0x12   :  { %106 = vst [vmem:[#allocation7 + $0x18] sm:$0xff] %v104_v13 }
  0x13   :  { %113 = vst [vmem:[#allocation7 + $0x20] sm:$0xff] %v111_v14 }
  0x14   :  { %172 = dma.vmem_to_hbm [thread:$0]  %s165_s1, 640, %s167_s23, [#allocation4], %s269_s17, %s269_s17, %s270_s18  }
  0x15   :  { %266 = dma.done.wait [#allocation4], 640  }
  0x16   :  { %267 = vsyncadd [#allocation4], 4294966656 }
  0x17   :  { %177 = vsyncpa [#allocation3], 1 }
  0x18   :  { %178 = vsyncpa [#allocation6], 1 }
  0x19   :  { %179 = vsyncpa [#allocation4], 1 }

</bundles_post_ra>
